<compile_context>
chip_gen: v6e
topology: v6e:2x2x1
jax: 0.10.0
libtpu: 0.0.40
codegen_flags: <defaults>
</compile_context>

<pallas_src>
import functools

import jax
import jax.numpy as jnp
from jax import lax
from jax.experimental import pallas as pl
from jax.experimental.pallas import tpu as pltpu

K = 3            # kernel_size
SCALE = 2        # pixel-shuffle scale factor
NUM_GROUPS = 16
EPS = 1e-6


# ----------------------------- Pallas kernel ------------------------------

def fused_matmul_gn_swish_kernel(w_ref, col_ref, g_ref, bt_ref, gm_ref, o_ref,
                                 *, eps, hw, samples):
    """Fused conv-as-matmul + (pre-shuffle) GroupNorm + Swish.

    w_ref  : (Cout4, K*K*Cin+1)        weights, conv bias folded into last column
    col_ref: (K*K*Cin+1, samples*HW)   lane-dense im2col patch matrix, last row = 1
    g_ref  : (Cout4, 1)                gamma expanded to conv channels (gamma[c4 // r^2])
    bt_ref : (Cout4, 1)                beta  expanded to conv channels
    gm_ref : (Cout4, Cout4)            block-diagonal group-averaging matrix
                                       (1 / group_elem_count on same-group entries)
    o_ref  : (samples, Cout4, HW)      conv+GN+Swish result (lane-dense; pixel
                                       shuffle is applied by the caller)
    """
    # Single MXU contraction (bias included): (Cout4, K+1) . (K+1, S*HW).
    acc = lax.dot_general(
        w_ref[...], col_ref[...],
        dimension_numbers=(((1,), (0,)), ((), ())),
        preferred_element_type=jnp.float32)               # (Cout4, S*HW) f32

    # Per-sample GroupNorm statistics over each 128-aligned HW lane segment.
    # (Pixel shuffle is a pure spatial permutation within each group -> identical
    # statistics on the pre-shuffle layout.)
    segs, s1, s2 = [], [], []
    for b in range(samples):
        seg = acc[:, b * hw:(b + 1) * hw]                  # static, 128-aligned
        segs.append(seg)
        s1.append(jnp.sum(seg, axis=1, keepdims=True))     # (Cout4, 1)
        s2.append(jnp.sum(seg * seg, axis=1, keepdims=True))

    # One merged group-averaging matmul: (Cout4, Cout4) . (Cout4, 2*S).
    stats = jnp.dot(gm_ref[...], jnp.concatenate(s1 + s2, axis=1),
                    preferred_element_type=jnp.float32)
    mean = stats[:, :samples]                              # (Cout4, S)
    ex2 = stats[:, samples:]                               # (Cout4, S)
    inv = lax.rsqrt(ex2 - mean * mean + eps)               # (Cout4, S)

    # Fold normalization + affine into a single FMA per tile.
    a = inv * g_ref[...]                                   # scale   (Cout4, S)
    c = bt_ref[...] - mean * a                             # shift   (Cout4, S)

    for b in range(samples):
        y = segs[b] * a[:, b:b + 1] + c[:, b:b + 1]        # one FMA pass
        o_ref[b] = (y * jax.nn.sigmoid(y)).astype(o_ref.dtype)   # Swish


# ------------------------------- wrapper ----------------------------------

def _samples_per_step(n):
    """Collapse the batch on single-TC chips (v5e/v6e); keep >=2 steps on v7x."""
    kind = ""
    try:
        kind = jax.devices()[0].device_kind.lower()
    except Exception:
        pass
    s = n
    if n >= 2 and ("v7" in kind or "7x" in kind):
        s = max(1, n // 2)            # >=2 parallel grid steps -> both TensorCores
    while n % s != 0:                  # must divide the batch
        s -= 1
    return max(1, s)


def upsample_subpix(x_nchw, w_hwio, bias, gamma, beta):
    """Forward pass of UpSample_SubPix. Input/output are NCHW float32."""
    N, Cin, H, W = x_nchw.shape
    Cout4 = w_hwio.shape[-1]
    r2 = SCALE * SCALE
    Cout = Cout4 // r2
    # Pre-shuffle GN statistics are only valid if all r^2 sub-channels of every
    # output channel land in the same group.
    assert Cout % NUM_GROUPS == 0, "channel->group mapping breaks the stats trick"
    pad = K // 2
    HW = H * W
    KC = K * K * Cin

    S = _samples_per_step(N)          # samples per grid step
    n_steps = N // S

    # Wrapper-side im2col (tiny XLA glue): lane-dense (KC+1, N*HW) patch matrix,
    # last row all ones (carries the conv bias through the matmul).
    xp = jnp.pad(x_nchw, ((0, 0), (0, 0), (pad, pad), (pad, pad)))   # NCHW halo
    taps = [xp[:, :, dy:dy + H, dx:dx + W] for dy in range(K) for dx in range(K)]
    col = jnp.stack(taps, axis=1).reshape(N, KC, HW)       # row = (dy*K+dx)*Cin+ci
    col = jnp.transpose(col, (1, 0, 2)).reshape(KC, N * HW)
    col = jnp.concatenate([col, jnp.ones((1, N * HW), col.dtype)], axis=0)

    # Weight matrix with the conv bias folded in as the last column.
    wmat = jnp.transpose(w_hwio, (3, 0, 1, 2)).reshape(Cout4, KC)
    wmat = jnp.concatenate([wmat, bias.reshape(Cout4, 1)], axis=1)   # (Cout4, KC+1)

    # GN affine params expanded to conv-output channels (c = c4 // r^2), plus the
    # block-diagonal group-averaging matrix (includes the 1/count factor).
    gamma_pc = jnp.repeat(gamma, r2).reshape(Cout4, 1)
    beta_pc = jnp.repeat(beta, r2).reshape(Cout4, 1)
    cgr = (Cout // NUM_GROUPS) * r2                        # conv channels per group
    gidx = jnp.arange(Cout4) // cgr
    gmat = (gidx[:, None] == gidx[None, :]).astype(jnp.float32) / (cgr * HW)

    kernel = functools.partial(fused_matmul_gn_swish_kernel,
                               eps=EPS, hw=HW, samples=S)
    out_k = pl.pallas_call(
        kernel,
        out_shape=jax.ShapeDtypeStruct((N, Cout4, HW), jnp.float32),
        grid_spec=pltpu.PrefetchScalarGridSpec(
            num_scalar_prefetch=0,
            grid=(n_steps,),
            in_specs=[
                pl.BlockSpec((Cout4, KC + 1), lambda n: (0, 0)),
                pl.BlockSpec((KC + 1, S * HW), lambda n: (0, n)),
                pl.BlockSpec((Cout4, 1), lambda n: (0, 0)),
                pl.BlockSpec((Cout4, 1), lambda n: (0, 0)),
                pl.BlockSpec((Cout4, Cout4), lambda n: (0, 0)),
            ],
            out_specs=pl.BlockSpec((S, Cout4, HW), lambda n: (n, 0, 0)),
        ),
        compiler_params=pltpu.CompilerParams(dimension_semantics=("parallel",)),
    )(wmat, col, gamma_pc, beta_pc, gmat)

    # Pixel shuffle: pure layout permutation, applied once to the final result.
    # c4 = c*r*r + ry*r + rx  (matches torch.nn.PixelShuffle).
    y = out_k.reshape(N, Cout, SCALE, SCALE, H, W)
    y = jnp.transpose(y, (0, 1, 4, 2, 5, 3)).reshape(N, Cout, H * SCALE, W * SCALE)
    return y                                               # NCHW, same as PyTorch


# ----------------------------- reference (JAX) -----------------------------

def ref_forward(x_nchw, w_hwio, bias, gamma, beta):
    x = jnp.transpose(x_nchw, (0, 2, 3, 1))
    conv = lax.conv_general_dilated(
        x, w_hwio, window_strides=(1, 1), padding="SAME",
        dimension_numbers=("NHWC", "HWIO", "NHWC"))
    conv = conv + bias[None, None, None, :]
    N, H, W, C4 = conv.shape
    C = C4 // (SCALE * SCALE)
    y = conv.reshape(N, H, W, C, SCALE, SCALE)
    y = jnp.transpose(y, (0, 1, 4, 2, 5, 3)).reshape(N, H * SCALE, W * SCALE, C)
    y = jnp.transpose(y, (0, 3, 1, 2))                     # NCHW
    Nn, Cc, Hs, Ws = y.shape
    yg = y.reshape(Nn, NUM_GROUPS, -1)
    mean = yg.mean(-1, keepdims=True)
    var = yg.var(-1, keepdims=True)
    yn = ((yg - mean) / jnp.sqrt(var + EPS)).reshape(Nn, Cc, Hs, Ws)
    yn = yn * gamma[None, :, None, None] + beta[None, :, None, None]
    return yn * jax.nn.sigmoid(yn)


# --------------------------------- main ------------------------------------

if __name__ == "__main__":
    # Small shapes consistent with the module:
    #   in_c=4, out_c=16 (divisible by num_groups=16), kernel_size=3, spatial 16x16.
    N, in_c, out_c, H, W = 2, 4, 16, 16, 16
    cout4 = out_c * SCALE * SCALE

    key = jax.random.PRNGKey(0)
    kx, kw, kb, kg, kbeta = jax.random.split(key, 5)

    x = jax.random.normal(kx, (N, in_c, H, W), dtype=jnp.float32)
    # Conv2d weights (stored HWIO), deterministic synthetic init.
    w = jax.random.normal(kw, (K, K, in_c, cout4), dtype=jnp.float32) * 0.1
    b = jax.random.normal(kb, (cout4,), dtype=jnp.float32) * 0.1
    # GroupNorm affine params (randomized to exercise the affine path).
    gamma = 1.0 + 0.1 * jax.random.normal(kg, (out_c,), dtype=jnp.float32)
    beta = 0.1 * jax.random.normal(kbeta, (out_c,), dtype=jnp.float32)

    out = jax.block_until_ready(upsample_subpix(x, w, b, gamma, beta))
    ref = jax.block_until_ready(ref_forward(x, w, b, gamma, beta))

    assert out.shape == (N, out_c, H * SCALE, W * SCALE), out.shape
    assert jnp.allclose(out, ref, atol=1e-4, rtol=1e-4), float(
        jnp.max(jnp.abs(out - ref)))

    print("KERNEL_OK")
</pallas_src>

<mosaic_0001>
module attributes {stable_mosaic.version = 11 : i64} {
  func.func @fused_matmul_gn_swish_kernel(%arg0: i32, %arg1: memref<64x37xf32, #tpu.memory_space<vmem>>, %arg2: memref<37x512xf32, #tpu.memory_space<vmem>>, %arg3: memref<64x1xf32, #tpu.memory_space<vmem>>, %arg4: memref<64x1xf32, #tpu.memory_space<vmem>>, %arg5: memref<64x64xf32, #tpu.memory_space<vmem>>, %arg6: memref<2x64x256xf32, #tpu.memory_space<vmem>>) attributes {dimension_semantics = [#tpu.dimension_semantics<parallel>], iteration_bounds = array<i64: 1>, scalar_prefetch = 0 : i64, scratch_operands = 0 : i64, tpu.core_type = #tpu.core_type<tc>, window_params = [{pipeline_mode = #tpu.pipeline_mode<synchronous>, transform_indices = @transform_0, window_bounds = array<i64: 64, 37>}, {transform_indices = @transform_1, window_bounds = array<i64: 37, 512>}, {pipeline_mode = #tpu.pipeline_mode<synchronous>, transform_indices = @transform_2, window_bounds = array<i64: 64, 1>}, {pipeline_mode = #tpu.pipeline_mode<synchronous>, transform_indices = @transform_3, window_bounds = array<i64: 64, 1>}, {pipeline_mode = #tpu.pipeline_mode<synchronous>, transform_indices = @transform_4, window_bounds = array<i64: 64, 64>}, {transform_indices = @transform_5, window_bounds = array<i64: 2, 64, 256>}]} {
    %c0 = arith.constant 0 : index
    %c0_0 = arith.constant 0 : index
    %0 = vector.load %arg1[%c0, %c0_0] : memref<64x37xf32, #tpu.memory_space<vmem>>, vector<64x37xf32>
    %c0_1 = arith.constant 0 : index
    %c0_2 = arith.constant 0 : index
    %1 = vector.load %arg2[%c0_1, %c0_2] : memref<37x512xf32, #tpu.memory_space<vmem>>, vector<37x512xf32>
    %cst = arith.constant dense<0.000000e+00> : vector<64x512xf32>
    %2 = tpu.matmul %0, %1, %cst {dimension_numbers = #tpu.dot_dimension_numbers<[1], [0], [0], [1], [0, 0, 1, 1], [], []>} : vector<64x37xf32>, vector<37x512xf32>, vector<64x512xf32> -> vector<64x512xf32>
    %3 = vector.extract_strided_slice %2 {offsets = [0, 0], sizes = [64, 256], strides = [1, 1]} : vector<64x512xf32> to vector<64x256xf32>
    %cst_3 = arith.constant dense<0.000000e+00> : vector<64xf32>
    %4 = vector.multi_reduction <add>, %3, %cst_3 [1] : vector<64x256xf32> to vector<64xf32>
    %5 = vector.shape_cast %4 : vector<64xf32> to vector<64x1xf32>
    %6 = arith.mulf %3, %3 : vector<64x256xf32>
    %cst_4 = arith.constant dense<0.000000e+00> : vector<64xf32>
    %7 = vector.multi_reduction <add>, %6, %cst_4 [1] : vector<64x256xf32> to vector<64xf32>
    %8 = vector.shape_cast %7 : vector<64xf32> to vector<64x1xf32>
    %9 = vector.extract_strided_slice %2 {offsets = [0, 256], sizes = [64, 256], strides = [1, 1]} : vector<64x512xf32> to vector<64x256xf32>
    %cst_5 = arith.constant dense<0.000000e+00> : vector<64xf32>
    %10 = vector.multi_reduction <add>, %9, %cst_5 [1] : vector<64x256xf32> to vector<64xf32>
    %11 = vector.shape_cast %10 : vector<64xf32> to vector<64x1xf32>
    %12 = arith.mulf %9, %9 : vector<64x256xf32>
    %cst_6 = arith.constant dense<0.000000e+00> : vector<64xf32>
    %13 = vector.multi_reduction <add>, %12, %cst_6 [1] : vector<64x256xf32> to vector<64xf32>
    %14 = vector.shape_cast %13 : vector<64xf32> to vector<64x1xf32>
    %c0_7 = arith.constant 0 : index
    %c0_8 = arith.constant 0 : index
    %15 = vector.load %arg5[%c0_7, %c0_8] : memref<64x64xf32, #tpu.memory_space<vmem>>, vector<64x64xf32>
    %16 = tpu.concatenate %5, %11, %8, %14 in 1 : vector<64x1xf32>, vector<64x1xf32>, vector<64x1xf32>, vector<64x1xf32> -> vector<64x4xf32>
    %cst_9 = arith.constant dense<0.000000e+00> : vector<64x4xf32>
    %17 = tpu.matmul %15, %16, %cst_9 {dimension_numbers = #tpu.dot_dimension_numbers<[1], [0], [0], [1], [0, 0, 1, 1], [], []>} : vector<64x64xf32>, vector<64x4xf32>, vector<64x4xf32> -> vector<64x4xf32>
    %18 = vector.extract_strided_slice %17 {offsets = [0, 0], sizes = [64, 2], strides = [1, 1]} : vector<64x4xf32> to vector<64x2xf32>
    %19 = vector.extract_strided_slice %17 {offsets = [0, 2], sizes = [64, 2], strides = [1, 1]} : vector<64x4xf32> to vector<64x2xf32>
    %20 = arith.mulf %18, %18 : vector<64x2xf32>
    %21 = arith.subf %19, %20 : vector<64x2xf32>
    %cst_10 = arith.constant 9.99999997E-7 : f32
    %22 = vector.broadcast %cst_10 : f32 to vector<64x2xf32>
    %23 = arith.addf %21, %22 : vector<64x2xf32>
    %24 = math.rsqrt %23 : vector<64x2xf32>
    %c0_11 = arith.constant 0 : index
    %c0_12 = arith.constant 0 : index
    %25 = vector.load %arg3[%c0_11, %c0_12] : memref<64x1xf32, #tpu.memory_space<vmem>>, vector<64x1xf32>
    %26 = vector.broadcast %25 : vector<64x1xf32> to vector<64x2xf32>
    %27 = arith.mulf %24, %26 : vector<64x2xf32>
    %c0_13 = arith.constant 0 : index
    %c0_14 = arith.constant 0 : index
    %28 = vector.load %arg4[%c0_13, %c0_14] : memref<64x1xf32, #tpu.memory_space<vmem>>, vector<64x1xf32>
    %29 = arith.mulf %18, %27 : vector<64x2xf32>
    %30 = vector.broadcast %28 : vector<64x1xf32> to vector<64x2xf32>
    %31 = arith.subf %30, %29 : vector<64x2xf32>
    %32 = vector.extract_strided_slice %27 {offsets = [0, 0], sizes = [64, 1], strides = [1, 1]} : vector<64x2xf32> to vector<64x1xf32>
    %33 = vector.broadcast %32 : vector<64x1xf32> to vector<64x256xf32>
    %34 = arith.mulf %3, %33 : vector<64x256xf32>
    %35 = vector.extract_strided_slice %31 {offsets = [0, 0], sizes = [64, 1], strides = [1, 1]} : vector<64x2xf32> to vector<64x1xf32>
    %36 = vector.broadcast %35 : vector<64x1xf32> to vector<64x256xf32>
    %37 = arith.addf %34, %36 : vector<64x256xf32>
    %38 = arith.negf %37 : vector<64x256xf32>
    %39 = math.exp %38 : vector<64x256xf32>
    %cst_15 = arith.constant 1.000000e+00 : f32
    %40 = vector.broadcast %cst_15 : f32 to vector<64x256xf32>
    %41 = arith.addf %40, %39 : vector<64x256xf32>
    %42 = arith.divf %40, %41 : vector<64x256xf32>
    %43 = arith.mulf %37, %42 : vector<64x256xf32>
    %c0_16 = arith.constant 0 : index
    %c0_17 = arith.constant 0 : index
    %c0_18 = arith.constant 0 : index
    %44 = vector.load %arg6[%c0_16, %c0_17, %c0_18] : memref<2x64x256xf32, #tpu.memory_space<vmem>>, vector<1x64x256xf32>
    %45 = vector.shape_cast %44 : vector<1x64x256xf32> to vector<64x256xf32>
    %46 = vector.shape_cast %43 : vector<64x256xf32> to vector<1x64x256xf32>
    tpu.vector_store %arg6[%c0_16, %c0_17, %c0_18], %46 {strides = array<i32>} : memref<2x64x256xf32, #tpu.memory_space<vmem>>, vector<1x64x256xf32>,
    %47 = vector.extract_strided_slice %27 {offsets = [0, 1], sizes = [64, 1], strides = [1, 1]} : vector<64x2xf32> to vector<64x1xf32>
    %48 = vector.broadcast %47 : vector<64x1xf32> to vector<64x256xf32>
    %49 = arith.mulf %9, %48 : vector<64x256xf32>
    %50 = vector.extract_strided_slice %31 {offsets = [0, 1], sizes = [64, 1], strides = [1, 1]} : vector<64x2xf32> to vector<64x1xf32>
    %51 = vector.broadcast %50 : vector<64x1xf32> to vector<64x256xf32>
    %52 = arith.addf %49, %51 : vector<64x256xf32>
    %53 = arith.negf %52 : vector<64x256xf32>
    %54 = math.exp %53 : vector<64x256xf32>
    %cst_19 = arith.constant 1.000000e+00 : f32
    %55 = vector.broadcast %cst_19 : f32 to vector<64x256xf32>
    %56 = arith.addf %55, %54 : vector<64x256xf32>
    %57 = arith.divf %55, %56 : vector<64x256xf32>
    %58 = arith.mulf %52, %57 : vector<64x256xf32>
    %c1 = arith.constant 1 : index
    %c0_20 = arith.constant 0 : index
    %c0_21 = arith.constant 0 : index
    %59 = vector.load %arg6[%c1, %c0_20, %c0_21] : memref<2x64x256xf32, #tpu.memory_space<vmem>>, vector<1x64x256xf32>
    %60 = vector.shape_cast %59 : vector<1x64x256xf32> to vector<64x256xf32>
    %61 = vector.shape_cast %58 : vector<64x256xf32> to vector<1x64x256xf32>
    tpu.vector_store %arg6[%c1, %c0_20, %c0_21], %61 {strides = array<i32>} : memref<2x64x256xf32, #tpu.memory_space<vmem>>, vector<1x64x256xf32>,
    return
  }
  func.func @transform_0(%arg0: i32) -> (i32, i32) {
    %c0_i32 = arith.constant 0 : i32
    %c0_i32_0 = arith.constant 0 : i32
    %c0_i32_1 = arith.constant 0 : i32
    return %c0_i32, %c0_i32_0 : i32, i32
  }
  func.func @transform_1(%arg0: i32) -> (i32, i32) {
    %c0_i32 = arith.constant 0 : i32
    %c0_i32_0 = arith.constant 0 : i32
    return %c0_i32, %arg0 : i32, i32
  }
  func.func @transform_2(%arg0: i32) -> (i32, i32) {
    %c0_i32 = arith.constant 0 : i32
    %c0_i32_0 = arith.constant 0 : i32
    %c0_i32_1 = arith.constant 0 : i32
    return %c0_i32, %c0_i32_0 : i32, i32
  }
  func.func @transform_3(%arg0: i32) -> (i32, i32) {
    %c0_i32 = arith.constant 0 : i32
    %c0_i32_0 = arith.constant 0 : i32
    %c0_i32_1 = arith.constant 0 : i32
    return %c0_i32, %c0_i32_0 : i32, i32
  }
  func.func @transform_4(%arg0: i32) -> (i32, i32) {
    %c0_i32 = arith.constant 0 : i32
    %c0_i32_0 = arith.constant 0 : i32
    %c0_i32_1 = arith.constant 0 : i32
    return %c0_i32, %c0_i32_0 : i32, i32
  }
  func.func @transform_5(%arg0: i32) -> (i32, i32, i32) {
    %c0_i32 = arith.constant 0 : i32
    %c0_i32_0 = arith.constant 0 : i32
    %c0_i32_1 = arith.constant 0 : i32
    return %arg0, %c0_i32, %c0_i32_0 : i32, i32, i32
  }
}

</mosaic_0001>

<bundles_post_ra>
// kernel: tpu_custom_call.1
= control target key start
LH: loop header
LB: loop body
LE: loop exit
PB: predicated region body
PF: predicated region fallthrough
CT: control target
= control target key end

     0   :  { %vm74_vm0 = vcmask 1044480   ;;  %vm49_vm1 = vcmask 302080   ;;  %s2291_s0 = inlined_call_operand.vmem [shape: f32[64,37], index: 0, kind: input, shape index: {}]   ;;  %s2292_s1 = inlined_call_operand.vmem [shape: f32[37,512], index: 1, kind: input, shape index: {}]   ;;  %s2293_s2 = inlined_call_operand.vmem [shape: f32[64,1], index: 2, kind: input, shape index: {}]   ;;  %s2294_s3 = inlined_call_operand.vmem [shape: f32[64,1], index: 3, kind: input, shape index: {}]   ;;  %s2295_s4 = inlined_call_operand.vmem [shape: f32[64,64], index: 4, kind: input, shape index: {}]   ;;  %s2296_s5 = inlined_call_operand.hbm [shape: f32[2,64,256], index: 5, kind: output, shape index: {}]  }
   0x1   :  { %v46_v0 = vld [vmem:[%s2292_s1 + $0x88] sm:$0x1f]  ;;  %v48_v1 = vld [vmem:[%s2292_s1 + $0x98] sm:$0x1f]  ;;  %v45_v3 = vld [vmem:[%s2292_s1 + $0x80] sm:$0x1f] }
   0x2   :  { %v42_v2 = vld [vmem:[%s2292_s1 + $0x68] sm:$0xff]  ;;  %1295 = vmatprep.subr.msk.mxu0 %vm74_vm0, %v46_v0  ;;  %1305 = vmatprep.subr.msk.mxu1 %vm74_vm0, %v48_v1  ;;  %v47_v4 = vld [vmem:[%s2292_s1 + $0x90] sm:$0x1f]  ;;  %v44_v5 = vld [vmem:[%s2292_s1 + $0x78] sm:$0xff] }
   0x3   :  { %1296 = vmatpush1.msk.msra.mxu0 %vm74_vm0, %v45_v3  ;;  %1306 = vmatpush1.msk.msra.mxu1 %vm74_vm0, %v47_v4  ;;  %v41_v6 = vld [vmem:[%s2292_s1 + $0x60] sm:$0xff]  ;;  %v43_v7 = vld [vmem:[%s2292_s1 + $0x70] sm:$0xff]  ;;  %v38_v8 = vld [vmem:[%s2292_s1 + $0x48] sm:$0xff] }
   0x4   :  { %111 = vmatprep.subr.mxu0 %v42_v2  ;;  %224 = vmatprep.subr.mxu1 %v44_v5  ;;  %v40_v9 = vld [vmem:[%s2292_s1 + $0x58] sm:$0xff]  ;;  %v37_v10 = vld [vmem:[%s2292_s1 + $0x40] sm:$0xff]  ;;  %v39_v11 = vld [vmem:[%s2292_s1 + $0x50] sm:$0xff] }
   0x5   :  { %112 = vmatpush1.msra.mxu0 %v41_v6  ;;  %225 = vmatpush1.msra.mxu1 %v43_v7  ;;  %v34_v12 = vld [vmem:[%s2292_s1 + $0x28] sm:$0xff]  ;;  %v36_v13 = vld [vmem:[%s2292_s1 + $0x38] sm:$0xff]  ;;  %v33_v14 = vld [vmem:[%s2292_s1 + $0x20] sm:$0xff] }
   0x6   :  { %113 = vmatprep.subr.mxu0 %v38_v8  ;;  %226 = vmatprep.subr.mxu1 %v40_v9  ;;  %v35_v15 = vld [vmem:[%s2292_s1 + $0x30] sm:$0xff]  ;;  %v30_v16 = vld [vmem:[%s2292_s1 + $0x8] sm:$0xff]  ;;  %v32_v17 = vld [vmem:[%s2292_s1 + $0x18] sm:$0xff] }
   0x7   :  { %114 = vmatpush1.msra.mxu0 %v37_v10  ;;  %227 = vmatpush1.msra.mxu1 %v39_v11  ;;  %v29_v18 = vld [vmem:[%s2292_s1] sm:$0xff]  ;;  %v31_v19 = vld [vmem:[%s2292_s1 + $0x10] sm:$0xff] }
   0x8   :  { %115 = vmatprep.subr.mxu0 %v34_v12  ;;  %228 = vmatprep.subr.mxu1 %v36_v13  ;;  %v21_v20 = vld [vmem:[%s2291_s0] sm:$0xff] }
   0x9   :  { %116 = vmatpush1.msra.mxu0 %v33_v14  ;;  %229 = vmatpush1.msra.mxu1 %v35_v15 }
   0xa   :  { %117 = vmatprep.subr.mxu0 %v30_v16  ;;  %230 = vmatprep.subr.mxu1 %v32_v17 }
   0xb   :  { %10 = vsyncpa [#allocation3], 0  ;;  %118 = vmatpush1.msra.mxu0 %v29_v18  ;;  %v1611_v21 = vmov 0.0   ;;  %231 = vmatpush1.msra.mxu1 %v31_v19  ;;  %v22_v22 = vld [vmem:[%s2291_s0 + $0x8] sm:$0xff]  ;;  %v23_v23 = vld [vmem:[%s2291_s0 + $0x10] sm:$0xff]  ;;  %vm476_vm2 = vcmask 523264  }
   0xc   :  { %151 = vmatprep.mubr.f32.mxu0 %v1611_v21  ;;  %264 = vmatprep.mubr.f32.mxu1 %v1611_v21  ;;  %v24_v24 = vld [vmem:[%s2291_s0 + $0x18] sm:$0xff]  ;;  %v25_v25 = vld [vmem:[%s2291_s0 + $0x20] sm:$0xff]  ;;  %v26_v26 = vld [vmem:[%s2291_s0 + $0x28] sm:$0xff]  ;;  %vm449_vm3 = vcmask 7168   ;;  %vm458_vm4 = vcmask 15360   ;;  %vm467_vm5 = vcmask 23552  }
   0xd   :  { %1297 = vmatmul.mubr.msk.f32.vlgmr.msra.gmra.mxu0 %vm49_vm1, %v21_v20  ;;  %1307 = vmatmul.mubr.msk.f32.vlgmr.msra.gmra.mxu1 %vm49_vm1, %v21_v20  ;;  %v27_v27 = vld [vmem:[%s2291_s0 + $0x30] sm:$0xff]  ;;  %v28_v28 = vld [vmem:[%s2291_s0 + $0x38] sm:$0xff]  ;;  %s1618_s15 = smov [#allocation2]  }
   0xe   :  { %157 = vmatprep.mubr.f32.mxu0 %v1611_v21  ;;  %270 = vmatprep.mubr.f32.mxu1 %v1611_v21  ;;  %s1284_s16 = sshll.u32 %s1618_s15, 4  ;;  %s1285_s16 = int_to_ptr.vmem [resolvable:$true] %s1284_s16 }
   0xf   :  { %s1589_s17 = scalar_lea.vmem %s1285_s16, 4096  ;;  %p1594_p1 = scmp.lt.s32.totalorder %s1285_s16, %s1285_s16 }
  0x10   :  { %p1590_p0 = scmp.ne.s32.totalorder %s1285_s16, %s1589_s17  ;;  %p1595_p2 = scmp.lt.s32.totalorder %s1589_s17, %s1589_s17 }
  0x11   :  { %1298 = vmatmul.mubr.msk.f32.gmra.mxu0 %vm49_vm1, %v22_v22  ;;  %1308 = vmatmul.mubr.msk.f32.gmra.mxu1 %vm49_vm1, %v22_v22 }
  0x12   :  { %163 = vmatprep.mubr.f32.mxu0 %v1611_v21  ;;  %276 = vmatprep.mubr.f32.mxu1 %v1611_v21  ;;  %p1596_p3 = por %p1595_p2, %p1594_p1 }
  0x14   :  { %p1597_p4 = pnand %p1596_p3, %p1590_p0 }
  0x15   :  { %1299 = vmatmul.mubr.msk.f32.gmra.mxu0 %vm49_vm1, %v23_v23  ;;  %1309 = vmatmul.mubr.msk.f32.gmra.mxu1 %vm49_vm1, %v23_v23 }
  0x16   :  { %169 = vmatprep.mubr.f32.mxu0 %v1611_v21  ;;  %282 = vmatprep.mubr.f32.mxu1 %v1611_v21 }
  0x19   :  { %1300 = vmatmul.mubr.msk.f32.gmra.mxu0 %vm49_vm1, %v24_v24  ;;  %1310 = vmatmul.mubr.msk.f32.gmra.mxu1 %vm49_vm1, %v24_v24 }
  0x1a   :  { %175 = vmatprep.mubr.f32.mxu0 %v1611_v21  ;;  %288 = vmatprep.mubr.f32.mxu1 %v1611_v21 }
  0x1d   :  { %1301 = vmatmul.mubr.msk.f32.gmra.mxu0 %vm49_vm1, %v25_v25  ;;  %1311 = vmatmul.mubr.msk.f32.gmra.mxu1 %vm49_vm1, %v25_v25 }
  0x1e   :  { %181 = vmatprep.mubr.f32.mxu0 %v1611_v21  ;;  %294 = vmatprep.mubr.f32.mxu1 %v1611_v21 }
  0x21   :  { %1302 = vmatmul.mubr.msk.f32.gmra.mxu0 %vm49_vm1, %v26_v26  ;;  %1312 = vmatmul.mubr.msk.f32.gmra.mxu1 %vm49_vm1, %v26_v26 }
  0x22   :  { %187 = vmatprep.mubr.f32.mxu0 %v1611_v21  ;;  %300 = vmatprep.mubr.f32.mxu1 %v1611_v21 }
  0x25   :  { %1303 = vmatmul.mubr.msk.f32.gmra.mxu0 %vm49_vm1, %v27_v27  ;;  %1313 = vmatmul.mubr.msk.f32.gmra.mxu1 %vm49_vm1, %v27_v27 }
  0x26   :  { %193 = vmatprep.mubr.f32.mxu0 %v1611_v21  ;;  %306 = vmatprep.mubr.f32.mxu1 %v1611_v21 }
  0x29   :  { %1304 = vmatmul.mubr.msk.f32.gmra.mxu0 %vm49_vm1, %v28_v28  ;;  %1314 = vmatmul.mubr.msk.f32.gmra.mxu1 %vm49_vm1, %v28_v28 }
  0xcd   :  { %v1751_v29 = vpop.f32.mrf.mxu0  ;;  %v1753_v30 = vpop.f32.mrf.mxu1 }
  0xcf   :  { %v1755_v31 = vpop.f32.mrf.mxu0  ;;  %v1757_v32 = vpop.f32.mrf.mxu1 }
  0xd1   :  { %v1759_v33 = vpop.f32.mrf.mxu0  ;;  %v1761_v34 = vpop.f32.mrf.mxu1 }
  0xd3   :  { %v1763_v35 = vpop.f32.mrf.mxu0  ;;  %v1765_v36 = vpop.f32.mrf.mxu1 }
  0xd4   :  { %v316_v37 = vadd.f32 %v1763_v35, %v1759_v33 }
  0xd5   :  { %v1769_v38 = vpop.f32.mrf.mxu0  ;;  %v1771_v39 = vpop.f32.mrf.mxu1 }
  0xd6   :  { %317 = vadd.xlane.f32.xlu1 %v316_v37  ;;  %v341_v44 = vmul.f32 %v1769_v38, %v1769_v38 }
  0xd7   :  { %v1773_v40 = vpop.f32.mrf.mxu0  ;;  %v1775_v41 = vpop.f32.mrf.mxu1 }
  0xd8   :  { %v383_v42 = vadd.f32 %v1775_v41, %v1771_v39  ;;  %v319_v43 = vadd.f32 %v1773_v40, %v1769_v38  ;;  %v342_v45 = vmul.f32 %v1773_v40, %v1773_v40 }
  0xd9   :  { %v1785_v46 = vpop.f32.mrf.mxu0  ;;  %v1787_v47 = vpop.f32.mrf.mxu1 }
  0xda   :  { %384 = vadd.xlane.f32.xlu0 %v383_v42  ;;  %320 = vadd.xlane.f32.xlu1 %v319_v43  ;;  %v407_v48 = vmul.f32 %v1787_v47, %v1787_v47  ;;  %v359_v51 = vadd.f32 %v342_v45, %v341_v44  ;;  %v343_v60 = vmul.f32 %v1785_v46, %v1785_v46 }
  0xdb   :  { %v1791_v49 = vpop.f32.mrf.mxu0  ;;  %v1793_v50 = vpop.f32.mrf.mxu1 }
  0xdc   :  { %v322_v52 = vadd.f32 %v1791_v49, %v1785_v46  ;;  %v408_v53 = vmul.f32 %v1793_v50, %v1793_v50  ;;  %v386_v59 = vadd.f32 %v1793_v50, %v1787_v47  ;;  %v344_v61 = vmul.f32 %v1791_v49, %v1791_v49 }
  0xdd   :  { %v1799_v54 = vpop.f32.mrf.mxu0  ;;  %v1801_v55 = vpop.f32.mrf.mxu1 }
  0xde   :  { %360 = vadd.xlane.f32.xlu0 %v359_v51  ;;  %323 = vadd.xlane.f32.xlu1 %v322_v52  ;;  %v426_v56 = vadd.f32 %v408_v53, %v407_v48  ;;  %v409_v63 = vmul.f32 %v1801_v55, %v1801_v55  ;;  %v362_v3 = vadd.f32 %v344_v61, %v343_v60 }
  0xdf   :  { %v1803_v57 = vpop.f32.mrf.mxu0  ;;  %v1805_v58 = vpop.f32.mrf.mxu1  ;;  %v345_v8 = vmul.f32 %v1799_v54, %v1799_v54 }
  0xe0   :  { %v325_v62 = vadd.f32 %v1803_v57, %v1799_v54  ;;  %v410_v0 = vmul.f32 %v1805_v58, %v1805_v58  ;;  %v389_v7 = vadd.f32 %v1805_v58, %v1801_v55  ;;  %v346_v9 = vmul.f32 %v1803_v57, %v1803_v57 }
  0xe1   :  { %v1819_v1 = vpop.f32.mrf.mxu0  ;;  %v1821_v2 = vpop.f32.mrf.mxu1 }
  0xe2   :  { %387 = vadd.xlane.f32.xlu0 %v386_v59  ;;  %427 = vadd.xlane.f32.xlu1 %v426_v56  ;;  %v429_v4 = vadd.f32 %v410_v0, %v409_v63  ;;  %v411_v12 = vmul.f32 %v1821_v2, %v1821_v2  ;;  %v365_v15 = vadd.f32 %v346_v9, %v345_v8 }
  0xe3   :  { %v1823_v5 = vpop.f32.mrf.mxu0  ;;  %v1825_v6 = vpop.f32.mrf.mxu1  ;;  %v347_v21 = vmul.f32 %v1819_v1, %v1819_v1  ;;  %v405_v63 = vmul.f32 %v1771_v39, %v1771_v39  ;;  %v404_v8 = vmul.f32 %v1765_v36, %v1765_v36  ;;  %v339_v9 = vmul.f32 %v1759_v33, %v1759_v33 }
  0xe4   :  { %v328_v11 = vadd.f32 %v1823_v5, %v1819_v1  ;;  %v412_v13 = vmul.f32 %v1825_v6, %v1825_v6  ;;  %v392_v20 = vadd.f32 %v1825_v6, %v1821_v2  ;;  %v348_v22 = vmul.f32 %v1823_v5, %v1823_v5 }
  0xe5   :  { %v1833_v10 = vpop.f32.mrf.mxu0  ;;  %v1841_v14 = vpop.f32.mrf.mxu1 }
  0xe6   :  { %363 = vadd.xlane.f32.xlu0 %v362_v3  ;;  %326 = vadd.xlane.f32.xlu1 %v325_v62  ;;  %2300 = vst [vmem:[#allocation5_spill] sm:$0xff] %v1841_v14  ;;  %v432_v17 = vadd.f32 %v412_v13, %v411_v12  ;;  %v413_v24 = vmul.f32 %v1841_v14, %v1841_v14 }
  0xe7   :  { %v1843_v16 = vpop.f32.mrf.mxu0  ;;  %v1845_v18 = vpop.f32.mrf.mxu1  ;;  %v368_v28 = vadd.f32 %v348_v22, %v347_v21  ;;  %v349_v48 = vmul.f32 %v1833_v10, %v1833_v10  ;;  %v406_v62 = vmul.f32 %v1775_v41, %v1775_v41  ;;  %v403_v12 = vmul.f32 %v1761_v34, %v1761_v34 }
  0xe8   :  { %2301 = vst [vmem:[#allocation6_spill] sm:$0xff] %v1845_v18  ;;  %v331_v23 = vadd.f32 %v1843_v16, %v1833_v10  ;;  %v414_v25 = vmul.f32 %v1845_v18, %v1845_v18  ;;  %v395_v45 = vadd.f32 %v1845_v18, %v1841_v14  ;;  %v350_v51 = vmul.f32 %v1843_v16, %v1843_v16 }
  0xe9   :  { %v1847_v19 = vpop.f32.mrf.mxu0  ;;  %v1863_v27 = vpop.f32.mrf.mxu1  ;;  %v423_v0 = vadd.f32 %v406_v62, %v405_v63  ;;  %v420_v13 = vadd.f32 %v404_v8, %v403_v12  ;;  %v377_v22 = vadd.f32 %v1757_v32, %v1753_v30 }
  0xea   :  { %390 = vadd.xlane.f32.xlu0 %v389_v7  ;;  %430 = vadd.xlane.f32.xlu1 %v429_v4  ;;  %v435_v37 = vadd.f32 %v414_v25, %v413_v24  ;;  %v351_v42 = vmul.f32 %v1847_v19, %v1847_v19  ;;  %v415_v53 = vmul.f32 %v1863_v27, %v1863_v27 }
  0xeb   :  { %v1861_v26 = vpop.f32.mrf.mxu0  ;;  %v1869_v44 = vpop.f32.mrf.mxu1  ;;  %v371_v59 = vadd.f32 %v350_v51, %v349_v48  ;;  %v313_v4 = vadd.f32 %v1755_v31, %v1751_v29  ;;  %v380_v7 = vadd.f32 %v1765_v36, %v1761_v34  ;;  %v338_v24 = vmul.f32 %v1755_v31, %v1755_v31 }
  0xec   :  { %v352_v43 = vmul.f32 %v1861_v26, %v1861_v26  ;;  %2302 = vst [vmem:[#allocation7_spill] sm:$0xff] %v1869_v44  ;;  %v416_v56 = vmul.f32 %v1869_v44, %v1869_v44  ;;  %v334_v61 = vadd.f32 %v1861_v26, %v1847_v19  ;;  %v398_v3 = vadd.f32 %v1869_v44, %v1863_v27 }
  0xee   :  { %366 = vadd.xlane.f32.xlu0 %v365_v15  ;;  %329 = vadd.xlane.f32.xlu1 %v328_v11  ;;  %v374_v52 = vadd.f32 %v352_v43, %v351_v42  ;;  %v438_v60 = vadd.f32 %v416_v56, %v415_v53  ;;  %v340_v11 = vmul.f32 %v1763_v35, %v1763_v35 }
  0xf0   :  { %v356_v15 = vadd.f32 %v340_v11, %v339_v9 }
  0xf2   :  { %393 = vadd.xlane.f32.xlu0 %v392_v20  ;;  %433 = vadd.xlane.f32.xlu1 %v432_v17  ;;  %v402_v17 = vmul.f32 %v1757_v32, %v1757_v32  ;;  %v401_v20 = vmul.f32 %v1753_v30, %v1753_v30 }
  0xf4   :  { %v417_v21 = vadd.f32 %v402_v17, %v401_v20 }
  0xf6   :  { %369 = vadd.xlane.f32.xlu0 %v368_v28  ;;  %332 = vadd.xlane.f32.xlu1 %v331_v23  ;;  %v337_v23 = vmul.f32 %v1751_v29, %v1751_v29  ;;  %v441_v28 = vld [vmem:[%s2295_s4] sm:$0xff] }
  0xf7   :  { %1387 = vmatprep.mubr.msk.f32.mxu0 %vm476_vm2, %v441_v28 }
  0xf8   :  { %v353_v25 = vadd.f32 %v338_v24, %v337_v23 }
  0xfa   :  { %396 = vadd.xlane.f32.xlu0 %v395_v45  ;;  %436 = vadd.xlane.f32.xlu1 %v435_v37  ;;  %v445_v37 = vld [vmem:[%s2295_s4 + $0x20] sm:$0xff] }
  0xfb   :  { %1393 = vmatprep.mubr.msk.f32.mxu1 %vm476_vm2, %v445_v37 }
  0xfe   :  { %372 = vadd.xlane.f32.xlu0 %v371_v59  ;;  %375 = vadd.xlane.f32.xlu1 %v374_v52 }
 0x102   :  { %439 = vadd.xlane.f32.xlu1 %v438_v60  ;;  %335 = vadd.xlane.f32.xlu0 %v334_v61 }
 0x106   :  { %424 = vadd.xlane.f32.xlu1 %v423_v0  ;;  %399 = vadd.xlane.f32.xlu0 %v398_v3 }
 0x10a   :  { %314 = vadd.xlane.f32.xlu1 %v313_v4  ;;  %381 = vadd.xlane.f32.xlu0 %v380_v7 }
 0x10e   :  { %421 = vadd.xlane.f32.xlu1 %v420_v13  ;;  %357 = vadd.xlane.f32.xlu0 %v356_v15 }
 0x112   :  { %418 = vadd.xlane.f32.xlu1 %v417_v21  ;;  %378 = vadd.xlane.f32.xlu0 %v377_v22 }
 0x116   :  { %354 = vadd.xlane.f32.xlu0 %v353_v25 }
 0x15f   :  { %v318_v42 = vpop.xlane.xlu1 %317 }
 0x163   :  { %v385_v43 = vpop.xlane.xlu0 %384  ;;  %v321_v45 = vpop.xlane.xlu1 %320 }
 0x167   :  { %v1919_v48 = vpop.xlane.xlu0 %360  ;;  %v324_v51 = vpop.xlane.xlu1 %323 }
 0x16b   :  { %v388_v52 = vpop.xlane.xlu0 %387  ;;  %v428_v53 = vpop.xlane.xlu1 %427 }
 0x16f   :  { %v364_v56 = vpop.xlane.xlu0 %363  ;;  %v327_v59 = vpop.xlane.xlu1 %326 }
 0x173   :  { %v391_v60 = vpop.xlane.xlu0 %390  ;;  %v431_v61 = vpop.xlane.xlu1 %430 }
 0x174   :  { %v454_v14 = vsel %vm449_vm3, %v327_v59, %v391_v60 }
 0x177   :  { %v367_v62 = vpop.xlane.xlu0 %366  ;;  %v330_v63 = vpop.xlane.xlu1 %329 }
 0x17b   :  { %v394_v0 = vpop.xlane.xlu0 %393  ;;  %v434_v3 = vpop.xlane.xlu1 %433 }
 0x17c   :  { %v455_v25 = vsel %vm449_vm3, %v330_v63, %v394_v0  ;;  %v453_v63 = vsel %vm449_vm3, %v324_v51, %v388_v52 }
 0x17f   :  { %v370_v4 = vpop.xlane.xlu0 %369  ;;  %v333_v7 = vpop.xlane.xlu1 %332 }
 0x180   :  { %v464_v37 = vsel %vm458_vm4, %v455_v25, %v370_v4  ;;  %v462_v4 = vsel %vm458_vm4, %v453_v63, %v364_v56 }
 0x181   :  { %v473_v0 = vsel %vm467_vm5, %v464_v37, %v434_v3  ;;  %v471_v52 = vsel %vm467_vm5, %v462_v4, %v428_v53 }
 0x183   :  { %v397_v8 = vpop.xlane.xlu0 %396  ;;  %v437_v9 = vpop.xlane.xlu1 %436 }
 0x184   :  { %v456_v21 = vsel %vm449_vm3, %v333_v7, %v397_v8  ;;  %v463_v8 = vsel %vm458_vm4, %v454_v14, %v367_v62  ;;  %v452_v14 = vsel %vm449_vm3, %v321_v45, %v385_v43 }
 0x185   :  { %v472_v60 = vsel %vm467_vm5, %v463_v8, %v431_v61  ;;  %v461_v56 = vsel %vm458_vm4, %v452_v14, %v1919_v48 }
 0x187   :  { %v373_v11 = vpop.xlane.xlu0 %372  ;;  %v376_v12 = vpop.xlane.xlu1 %375 }
 0x188   :  { %v465_v23 = vsel %vm458_vm4, %v456_v21, %v373_v11  ;;  %v442_v11 = vld [vmem:[%s2295_s4 + $0x8] sm:$0xff] }
 0x189   :  { %v474_v7 = vsel %vm467_vm5, %v465_v23, %v437_v9 }
 0x18b   :  { %v440_v13 = vpop.xlane.xlu1 %439  ;;  %v336_v15 = vpop.xlane.xlu0 %335 }
 0x18f   :  { %v425_v17 = vpop.xlane.xlu1 %424  ;;  %v400_v20 = vpop.xlane.xlu0 %399 }
 0x190   :  { %v457_v22 = vsel %vm449_vm3, %v336_v15, %v400_v20  ;;  %v470_v61 = vsel %vm467_vm5, %v461_v56, %v425_v17  ;;  %v444_v15 = vld [vmem:[%s2295_s4 + $0x18] sm:$0xff]  ;;  %v1612_v20 = vmov 0   ;;  %v671_v56 = vld [vmem:[%s2293_s2 + $0x8] sm:$0xff] }
 0x191   :  { %v466_v24 = vsel %vm458_vm4, %v457_v22, %v376_v12  ;;  %v446_v12 = vld [vmem:[%s2295_s4 + $0x28] sm:$0xff]  ;;  %v448_v17 = vld [vmem:[%s2295_s4 + $0x38] sm:$0xff]  ;;  %1425 = vset.pattern.permute.xlu0 %v1612_v20  ;;  %1426 = vset.pattern.permute.xlu1 %v1612_v20 }
 0x192   :  { %v475_v28 = vsel %vm467_vm5, %v466_v24, %v440_v13  ;;  %v447_v13 = vld [vmem:[%s2295_s4 + $0x30] sm:$0xff] }
 0x193   :  { %1371 = vmatprep.subr.mxu0 %v475_v28  ;;  %1399 = vmatprep.subr.mxu1 %v475_v28  ;;  %v382_v18 = vpop.xlane.xlu0 %381  ;;  %v315_v44 = vpop.xlane.xlu1 %314 }
 0x194   :  { %1372 = vmatpush3.msra.mxu0 %v475_v28  ;;  %1407 = vmatpush3.msra.mxu1 %v475_v28  ;;  %v451_v62 = vsel %vm449_vm3, %v318_v42, %v382_v18 }
 0x195   :  { %1373 = vmatprep.subr.mxu0 %v474_v7  ;;  %1400 = vmatprep.subr.mxu1 %v474_v7 }
 0x196   :  { %1374 = vmatpush3.msra.mxu0 %v474_v7  ;;  %1408 = vmatpush3.msra.mxu1 %v474_v7 }
 0x197   :  { %1375 = vmatprep.subr.mxu0 %v473_v0  ;;  %1401 = vmatprep.subr.mxu1 %v473_v0  ;;  %v358_v59 = vpop.xlane.xlu0 %357  ;;  %v422_v51 = vpop.xlane.xlu1 %421 }
 0x198   :  { %1376 = vmatpush3.msra.mxu0 %v473_v0  ;;  %1409 = vmatpush3.msra.mxu1 %v473_v0  ;;  %v460_v3 = vsel %vm458_vm4, %v451_v62, %v358_v59  ;;  %v670_v62 = vld [vmem:[%s2293_s2] sm:$0xff] }
 0x199   :  { %1377 = vmatprep.subr.mxu0 %v472_v60  ;;  %1402 = vmatprep.subr.mxu1 %v472_v60  ;;  %v469_v18 = vsel %vm467_vm5, %v460_v3, %v422_v51  ;;  %v675_v3 = vld [vmem:[%s2293_s2 + $0x28] sm:$0xff] }
 0x19a   :  { %1378 = vmatpush3.msra.mxu0 %v472_v60  ;;  %1410 = vmatpush3.msra.mxu1 %v472_v60 }
 0x19b   :  { %1379 = vmatprep.subr.mxu0 %v471_v52  ;;  %1403 = vmatprep.subr.mxu1 %v471_v52  ;;  %v379_v9 = vpop.xlane.xlu0 %378  ;;  %v419_v45 = vpop.xlane.xlu1 %418 }
 0x19c   :  { %1380 = vmatpush3.msra.mxu0 %v471_v52  ;;  %1411 = vmatpush3.msra.mxu1 %v471_v52  ;;  %v450_v42 = vsel %vm449_vm3, %v315_v44, %v379_v9  ;;  %v443_v44 = vld [vmem:[%s2295_s4 + $0x10] sm:$0xff]  ;;  %s1613_s4 = smov 2   ;;  %v673_v52 = vld [vmem:[%s2293_s2 + $0x18] sm:$0xff] }
 0x19d   :  { %1381 = vmatprep.subr.mxu0 %v470_v61  ;;  %1404 = vmatprep.subr.mxu1 %v470_v61  ;;  %v672_v9 = vld [vmem:[%s2293_s2 + $0x10] sm:$0xff] }
 0x19e   :  { %1382 = vmatpush3.msra.mxu0 %v470_v61  ;;  %1412 = vmatpush3.msra.mxu1 %v470_v61  ;;  %v677_v61 = vld [vmem:[%s2293_s2 + $0x38] sm:$0xff] }
 0x19f   :  { %1383 = vmatprep.subr.mxu0 %v469_v18  ;;  %1405 = vmatprep.subr.mxu1 %v469_v18  ;;  %v355_v43 = vpop.xlane.xlu0 %354 }
 0x1a0   :  { %v459_v48 = vsel %vm458_vm4, %v450_v42, %v355_v43  ;;  %1384 = vmatpush3.msra.mxu0 %v469_v18  ;;  %1413 = vmatpush3.msra.mxu1 %v469_v18  ;;  %v674_v18 = vld [vmem:[%s2293_s2 + $0x20] sm:$0xff]  ;;  %v727_v42 = vld [vmem:[%s2294_s3 + $0x8] sm:$0xff]  ;;  %v676_v43 = vld [vmem:[%s2293_s2 + $0x30] sm:$0xff] }
 0x1a1   :  { %v468_v53 = vsel %vm467_vm5, %v459_v48, %v419_v45  ;;  %v729_v45 = vld [vmem:[%s2294_s3 + $0x18] sm:$0xff]  ;;  %v726_v48 = vld [vmem:[%s2294_s3] sm:$0xff] }
 0x1a2   :  { %1385 = vmatprep.subr.mxu0 %v468_v53  ;;  %1406 = vmatprep.subr.mxu1 %v468_v53 }
 0x1a3   :  { %1386 = vmatpush3.msra.mxu0 %v468_v53  ;;  %1414 = vmatpush3.msra.mxu1 %v468_v53  ;;  %v731_v53 = vld [vmem:[%s2294_s3 + $0x28] sm:$0xff] }
 0x1a4   :  { %1388 = vmatmul.mubr.msk.f32.vlgmr.msra.gmra.mxu0 %vm476_vm2, %v442_v11  ;;  %1394 = vmatmul.mubr.msk.f32.vlgmr.msra.gmra.mxu1 %vm476_vm2, %v446_v12  ;;  %v728_v11 = vld [vmem:[%s2294_s3 + $0x10] sm:$0xff]  ;;  %v733_v12 = vld [vmem:[%s2294_s3 + $0x38] sm:$0xff] }
 0x1a5   :  { %1390 = vmatprep.mubr.msk.f32.mxu0 %vm476_vm2, %v443_v44  ;;  %1396 = vmatprep.mubr.msk.f32.mxu1 %vm476_vm2, %v447_v13  ;;  %v730_v44 = vld [vmem:[%s2294_s3 + $0x20] sm:$0xff]  ;;  %v732_v13 = vld [vmem:[%s2294_s3 + $0x30] sm:$0xff]  ;;  %s1616_s3 = smov 126  }
 0x1a8   :  { %1391 = vmatmul.mubr.msk.f32.gmra.mxu0 %vm476_vm2, %v444_v15  ;;  %1397 = vmatmul.mubr.msk.f32.gmra.mxu1 %vm476_vm2, %v448_v17  ;;  %v1614_v15 = vmov 3   ;;  %v1615_v17 = vmov 2  }
 0x264   :  { %v1972_v21 = vpop.f32.mrf.mxu0  ;;  %v1974_v22 = vpop.f32.mrf.mxu1 }
 0x265   :  { %v607_v23 = vmul.f32 %v1972_v21, %v1972_v21  ;;  %v611_v37 = vmul.f32 %v1974_v22, %v1974_v22 }
 0x266   :  { %v1978_v24 = vpop.f32.mrf.mxu0  ;;  %v1980_v25 = vpop.f32.mrf.mxu1 }
 0x267   :  { %v606_v28 = vmul.f32 %v1978_v24, %v1978_v24  ;;  %624 = vrot.lane.b32.xlu1 %v607_v23, %s1613_s4  ;;  %v610_v0 = vmul.f32 %v1980_v25, %v1980_v25 }
 0x268   :  { %v1986_v7 = vpop.f32.mrf.mxu1  ;;  %v1988_v8 = vpop.f32.mrf.mxu0 }
 0x269   :  { %622 = vrot.lane.b32.xlu0 %v606_v28, %s1613_s4  ;;  %v609_v4 = vmul.f32 %v1988_v8, %v1988_v8  ;;  %v613_v60 = vmul.f32 %v1986_v7, %v1986_v7 }
 0x26a   :  { %v1990_v63 = vpop.f32.mrf.mxu1  ;;  %v2000_v14 = vpop.f32.mrf.mxu0 }
 0x26b   :  { %632 = vrot.lane.b32.xlu1 %v611_v37, %s1613_s4  ;;  %v612_v59 = vmul.f32 %v1990_v63, %v1990_v63  ;;  %v608_v51 = vmul.f32 %v2000_v14, %v2000_v14 }
 0x26d   :  { %630 = vrot.lane.b32.xlu0 %v610_v0, %s1613_s4 }
 0x26f   :  { %628 = vrot.lane.b32.xlu1 %v609_v4, %s1613_s4 }
 0x271   :  { %634 = vrot.lane.b32.xlu0 %v612_v59, %s1613_s4 }
 0x273   :  { %636 = vrot.lane.b32.xlu1 %v613_v60, %s1613_s4 }
 0x275   :  { %680 = vperm.xlu0 %1425, %v670_v62  }
 0x277   :  { %626 = vrot.lane.b32.xlu1 %v608_v51, %s1613_s4 }
 0x279   :  { %695 = vperm.xlu0 %1425, %v673_v52  }
 0x27b   :  { %685 = vperm.xlu1 %1426, %v671_v56  }
 0x27d   :  { %705 = vperm.xlu0 %1425, %v675_v3  }
 0x27f   :  { %690 = vperm.xlu1 %1426, %v672_v9  }
 0x281   :  { %715 = vperm.xlu0 %1425, %v677_v61  }
 0x283   :  { %700 = vperm.xlu1 %1426, %v674_v18  }
 0x285   :  { %781 = vperm.xlu0 %1425, %v727_v42  }
 0x287   :  { %710 = vperm.xlu1 %1426, %v676_v43  }
 0x289   :  { %791 = vperm.xlu0 %1425, %v729_v45  }
 0x28b   :  { %776 = vperm.xlu1 %1426, %v726_v48  }
 0x28d   :  { %801 = vperm.xlu0 %1425, %v731_v53  }
 0x28f   :  { %786 = vperm.xlu1 %1426, %v728_v11  }
 0x291   :  { %811 = vperm.xlu0 %1425, %v733_v12  }
 0x293   :  { %796 = vperm.xlu1 %1426, %v730_v44  }
 0x295   :  { %1428 = vset.pattern.permute.xlu0 %v1614_v15 }
 0x297   :  { %806 = vperm.xlu1 %1426, %v732_v13  }
 0x29b   :  { %1427 = vset.pattern.permute.xlu1 %v1615_v17 }
 0x2d9   :  { %v625_v23 = vpop.permute.xlu1 %624 }
 0x2da   :  { %v647_v59 = vsub.f32 %v1972_v21, %v625_v23 }
 0x2db   :  { %v623_v28 = vpop.permute.xlu0 %622 }
 0x2dc   :  { %v646_v37 = vsub.f32 %v1978_v24, %v623_v28  ;;  %v655_v62 = vadd.f32 1e-06, %v647_v59 }
 0x2dd   :  { %v633_v0 = vpop.permute.xlu1 %632 }
 0x2de   :  { %v654_v4 = vadd.f32 1e-06, %v646_v37  ;;  %v651_v51 = vsub.f32 %v1974_v22, %v633_v0 }
 0x2df   :  { %v631_v52 = vpop.permute.xlu0 %630 }
 0x2e0   :  { %1445 = vrsqrt.f32 %v654_v4  ;;  %v659_v3 = vadd.f32 1e-06, %v651_v51  ;;  %v650_v9 = vsub.f32 %v1980_v25, %v631_v52 }
 0x2e1   :  { %v629_v60 = vpop.permute.xlu1 %628  ;;  %1447 = vrsqrt.f32 %v655_v62 }
 0x2e2   :  { %v649_v56 = vsub.f32 %v1988_v8, %v629_v60  ;;  %1449 = vrsqrt.f32 %v659_v3  ;;  %v658_v43 = vadd.f32 1e-06, %v650_v9 }
 0x2e3   :  { %v635_v42 = vpop.permute.xlu0 %634 }
 0x2e4   :  { %v657_v18 = vadd.f32 1e-06, %v649_v56  ;;  %v652_v60 = vsub.f32 %v1990_v63, %v635_v42 }
 0x2e5   :  { %v637_v61 = vpop.permute.xlu1 %636 }
 0x2e6   :  { %v653_v45 = vsub.f32 %v1986_v7, %v637_v61  ;;  %1451 = vrsqrt.f32 %v657_v18  ;;  %v660_v3 = vadd.f32 1e-06, %v652_v60 }
 0x2e7   :  { %1453 = vrsqrt.f32 %v658_v43 }
 0x2e8   :  { %v661_v12 = vadd.f32 1e-06, %v653_v45 }
 0x2e9   :  { %v627_v53 = vpop.permute.xlu1 %626 }
 0x2ea   :  { %v648_v13 = vsub.f32 %v2000_v14, %v627_v53  ;;  %1455 = vrsqrt.f32 %v661_v12 }
 0x2ec   :  { %v656_v0 = vadd.f32 1e-06, %v648_v13 }
 0x2ed   :  { %v1446_v48 = vpop.eup %1445 }
 0x2ee   :  { %v1448_v28 = vpop.eup %1447  ;;  %1457 = vrsqrt.f32 %v656_v0 }
 0x2ef   :  { %v1450_v62 = vpop.eup %1449  ;;  %1459 = vrsqrt.f32 %v660_v3 }
 0x2f0   :  { %v681_v11 = vpop.permute.xlu0 %680 }
 0x2f1   :  { %v718_v44 = vmul.f32 %v1446_v48, %v681_v11 }
 0x2f3   :  { %742 = vrot.lane.b32.xlu1 %v718_v44, %s1616_s3  ;;  %v1452_v56 = vpop.eup %1451 }
 0x2f4   :  { %v696_v23 = vpop.permute.xlu0 %695  ;;  %v1454_v9 = vpop.eup %1453 }
 0x2f5   :  { %v721_v18 = vmul.f32 %v1452_v56, %v696_v23 }
 0x2f6   :  { %v686_v37 = vpop.permute.xlu1 %685 }
 0x2f7   :  { %v719_v4 = vmul.f32 %v1448_v28, %v686_v37  ;;  %v1456_v42 = vpop.eup %1455 }
 0x2f8   :  { %v706_v59 = vpop.permute.xlu0 %705 }
 0x2f9   :  { %744 = vrot.lane.b32.xlu0 %v719_v4, %s1616_s3  ;;  %v723_v52 = vmul.f32 %v1450_v62, %v706_v59 }
 0x2fa   :  { %v691_v51 = vpop.permute.xlu1 %690 }
 0x2fb   :  { %v1458_v53 = vpop.eup %1457 }
 0x2fc   :  { %v716_v45 = vpop.permute.xlu0 %715  ;;  %v720_v11 = vmul.f32 %v1458_v53, %v691_v51  ;;  %v1460_v13 = vpop.eup %1459 }
 0x2fd   :  { %752 = vrot.lane.b32.xlu0 %v723_v52, %s1616_s3  ;;  %v725_v48 = vmul.f32 %v1456_v42, %v716_v45 }
 0x2fe   :  { %v701_v61 = vpop.permute.xlu1 %700 }
 0x2ff   :  { %v722_v43 = vmul.f32 %v1454_v9, %v701_v61 }
 0x301   :  { %748 = vrot.lane.b32.xlu0 %v721_v18, %s1616_s3  ;;  %750 = vrot.lane.b32.xlu1 %v722_v43, %s1616_s3 }
 0x302   :  { %v711_v12 = vpop.permute.xlu1 %710 }
 0x303   :  { %v724_v23 = vmul.f32 %v1460_v13, %v711_v12 }
 0x305   :  { %756 = vrot.lane.b32.xlu0 %v725_v48, %s1616_s3  ;;  %823 = vperm.xlu1 %1427, %v718_v44  }
 0x306   :  { %v777_v28 = vpop.permute.xlu1 %776 }
 0x309   :  { %1055 = vperm.xlu0 %1428, %v718_v44   ;;  %835 = vperm.xlu1 %1427, %v721_v18   ;;  %v782_v44 = vpop.permute.xlu0 %781 }
 0x30a   :  { %v787_v0 = vpop.permute.xlu1 %786 }
 0x30d   :  { %1067 = vperm.xlu0 %1428, %v721_v18   ;;  %746 = vrot.lane.b32.xlu1 %v720_v11, %s1616_s3  ;;  %v792_v37 = vpop.permute.xlu0 %791 }
 0x30e   :  { %v797_v60 = vpop.permute.xlu1 %796 }
 0x311   :  { %1075 = vperm.xlu0 %1428, %v723_v52   ;;  %754 = vrot.lane.b32.xlu1 %v724_v23, %s1616_s3  ;;  %v802_v59 = vpop.permute.xlu0 %801 }
 0x312   :  { %v807_v62 = vpop.permute.xlu1 %806 }
 0x315   :  { %1083 = vperm.xlu0 %1428, %v725_v48   ;;  %843 = vperm.xlu1 %1427, %v723_v52  }
 0x319   :  { %1430 = vset.pattern.permute.xlu0 %v1615_v17  ;;  %851 = vperm.xlu1 %1427, %v725_v48  }
 0x31a   :  { %827 = vperm.xlu0 %1430, %v719_v4  }
 0x31d   :  { %1429 = vset.pattern.permute.xlu1 %v1614_v15 }
 0x31e   :  { %839 = vperm.xlu0 %1430, %v722_v43   ;;  %1059 = vperm.xlu1 %1429, %v719_v4   ;;  %v812_v4 = vpop.permute.xlu0 %811 }
 0x322   :  { %847 = vperm.xlu0 %1430, %v724_v23   ;;  %1071 = vperm.xlu1 %1429, %v722_v43   ;;  %v1617_v43 = vmov 1  }
 0x326   :  { %1431 = vset.pattern.permute.xlu1 %v1615_v17  ;;  %1433 = vset.pattern.permute.xlu0 %v1612_v20 }
 0x327   :  { %831 = vperm.xlu1 %1431, %v720_v11  }
 0x32b   :  { %1432 = vset.pattern.permute.xlu1 %v1614_v15 }
 0x32c   :  { %1063 = vperm.xlu1 %1432, %v720_v11  }
 0x330   :  { %1079 = vperm.xlu1 %1432, %v724_v23  }
 0x334   :  { %1434 = vset.pattern.permute.xlu1 %v1612_v20 }
 0x365   :  { %v743_v56 = vpop.permute.xlu1 %742 }
 0x366   :  { %v766_v45 = vmul.f32 %v743_v56, %v1978_v24 }
 0x368   :  { %v814_v48 = vsub.f32 %v777_v28, %v766_v45 }
 0x36b   :  { %v745_v51 = vpop.permute.xlu0 %744 }
 0x36c   :  { %v767_v17 = vmul.f32 %v1972_v21, %v745_v51 }
 0x36e   :  { %v815_v52 = vsub.f32 %v782_v44, %v767_v17 }
 0x36f   :  { %v753_v3 = vpop.permute.xlu0 %752 }
 0x370   :  { %v771_v15 = vmul.f32 %v1974_v22, %v753_v3  ;;  %877 = vperm.xlu0 %1433, %v815_v52  }
 0x372   :  { %v819_v9 = vsub.f32 %v802_v59, %v771_v15 }
 0x373   :  { %v751_v61 = vpop.permute.xlu1 %750  ;;  %v749_v21 = vpop.permute.xlu0 %748 }
 0x374   :  { %v770_v18 = vmul.f32 %v751_v61, %v1980_v25  ;;  %1436 = vset.pattern.permute.xlu0 %v1617_v43  ;;  %897 = vperm.xlu1 %1434, %v819_v9   ;;  %v769_v22 = vmul.f32 %v1988_v8, %v749_v21 }
 0x375   :  { %1123 = vperm.xlu0 %1436, %v819_v9  }
 0x376   :  { %v818_v42 = vsub.f32 %v797_v60, %v770_v18  ;;  %v817_v53 = vsub.f32 %v792_v37, %v769_v22 }
 0x377   :  { %v757_v24 = vpop.permute.xlu0 %756 }
 0x378   :  { %1435 = vset.pattern.permute.xlu1 %v1617_v43  ;;  %v773_v12 = vmul.f32 %v1986_v7, %v757_v24 }
 0x379   :  { %1438 = vset.pattern.permute.xlu0 %v1612_v20  ;;  %1107 = vperm.xlu1 %1435, %v815_v52  }
 0x37a   :  { %892 = vperm.xlu0 %1438, %v818_v42   ;;  %v821_v13 = vsub.f32 %v812_v4, %v773_v12 }
 0x37d   :  { %1437 = vset.pattern.permute.xlu1 %v1612_v20 }
 0x37e   :  { %872 = vperm.xlu1 %1437, %v814_v48   ;;  %1439 = vset.pattern.permute.xlu0 %v1617_v43 }
 0x37f   :  { %1103 = vperm.xlu0 %1439, %v814_v48  }
 0x380   :  { %v2083_v25 = vpop.permute.xlu1 %823 }
 0x382   :  { %1440 = vset.pattern.permute.xlu1 %v1617_v43 }
 0x383   :  { %1119 = vperm.xlu1 %1440, %v818_v42   ;;  %1115 = vperm.xlu0 %1439, %v817_v53  }
 0x384   :  { %v2085_v11 = vpop.permute.xlu1 %835  ;;  %v1056_v7 = vpop.permute.xlu0 %1055 }
 0x387   :  { %1441 = vset.pattern.permute.xlu1 %v1612_v20  ;;  %1442 = vset.pattern.permute.xlu0 %v1612_v20 }
 0x388   :  { %887 = vperm.xlu1 %1441, %v817_v53   ;;  %v747_v8 = vpop.permute.xlu1 %746  ;;  %v2092_v60 = vpop.permute.xlu0 %1067 }
 0x389   :  { %v768_v23 = vmul.f32 %v747_v8, %v2000_v14 }
 0x38b   :  { %v816_v37 = vsub.f32 %v787_v0, %v768_v23 }
 0x38c   :  { %907 = vperm.xlu1 %1441, %v821_v13   ;;  %v755_v44 = vpop.permute.xlu1 %754  ;;  %v1076_v14 = vpop.permute.xlu0 %1075 }
 0x38d   :  { %v772_v28 = vmul.f32 %v755_v44, %v1990_v63  ;;  %v1096_v53 = vmul.f32 %v1076_v14, %v1821_v2 }
 0x38f   :  { %v820_v59 = vsub.f32 %v807_v62, %v772_v28 }
 0x390   :  { %882 = vperm.xlu1 %1441, %v816_v37   ;;  %v844_v20 = vpop.permute.xlu1 %843  ;;  %v2096_v17 = vpop.permute.xlu0 %1083 }
 0x391   :  { %902 = vperm.xlu0 %1442, %v820_v59   ;;  %v864_v42 = vmul.f32 %v844_v20, %v1819_v1  ;;  %v865_v21 = vmul.f32 %v844_v20, %v1823_v5 }
 0x394   :  { %1443 = vset.pattern.permute.xlu1 %v1617_v43  ;;  %v2094_v4 = vpop.permute.xlu1 %851 }
 0x395   :  { %1111 = vperm.xlu1 %1443, %v816_v37   ;;  %1444 = vset.pattern.permute.xlu0 %v1617_v43  ;;  %v828_v0 = vpop.permute.xlu0 %827 }
 0x396   :  { %1131 = vperm.xlu0 %1444, %v821_v13   ;;  %v856_v15 = vmul.f32 %v828_v0, %v1759_v33  ;;  %v857_v9 = vmul.f32 %v828_v0, %v1763_v35  ;;  %v1097_v33 = vmul.f32 %v1076_v14, %v1825_v6 }
 0x399   :  { %1127 = vperm.xlu1 %1443, %v820_v59   ;;  %v1060_v51 = vpop.permute.xlu1 %1059  ;;  %v840_v52 = vpop.permute.xlu0 %839 }
 0x39a   :  { %v1088_v2 = vmul.f32 %v1060_v51, %v1761_v34  ;;  %v1089_v6 = vmul.f32 %v1060_v51, %v1765_v36  ;;  %v862_v37 = vmul.f32 %v840_v52, %v1799_v54  ;;  %v863_v59 = vmul.f32 %v840_v52, %v1803_v57 }
 0x39b   :  { %v854_v57 = vmul.f32 %v2083_v25, %v1751_v29  ;;  %v855_v52 = vmul.f32 %v2083_v25, %v1755_v31 }
 0x39d   :  { %v2098_v63 = vpop.permute.xlu1 %1071  ;;  %v2104_v3 = vpop.permute.xlu0 %847 }
 0x3a2   :  { %v2100_v62 = vpop.permute.xlu1 %831 }
 0x3a7   :  { %v2102_v56 = vpop.permute.xlu1 %1063 }
 0x3ab   :  { %v2108_v61 = vpop.permute.xlu1 %1079 }
 0x3eb   :  { %v878_v18 = vpop.permute.xlu0 %877 }
 0x3ec   :  { %v2110_v43 = vadd.f32 %v878_v18, %v856_v15  ;;  %v2112_v45 = vadd.f32 %v878_v18, %v857_v9 }
 0x3ee   :  { %v1325_v48 = vmul.f32 -1.442695, %v2110_v43  ;;  %v1326_v22 = vmul.f32 -1.442695, %v2112_v45 }
 0x3ef   :  { %v898_v35 = vpop.permute.xlu1 %897 }
 0x3f0   :  { %1461 = vpow2.f32 %v1325_v48  ;;  %v2120_v24 = vadd.f32 %v898_v35, %v864_v42  ;;  %v2122_v12 = vadd.f32 %v898_v35, %v865_v21  ;;  %v1124_v8 = vpop.permute.xlu0 %1123  ;;  %v1086_v42 = vmul.f32 %v1056_v7, %v1753_v30 }
 0x3f1   :  { %1463 = vpow2.f32 %v1326_v22  ;;  %v2124_v13 = vadd.f32 %v1124_v8, %v1096_v53  ;;  %v2126_v1 = vadd.f32 %v1124_v8, %v1097_v33  ;;  %v1087_v21 = vmul.f32 %v1056_v7, %v1757_v32 }
 0x3f2   :  { %v1333_v5 = vmul.f32 -1.442695, %v2120_v24  ;;  %v1334_v23 = vmul.f32 -1.442695, %v2122_v12  ;;  %v1092_v7 = vmul.f32 %v2092_v60, %v1787_v47  ;;  %v1093_v47 = vmul.f32 %v2092_v60, %v1793_v50 }
 0x3f3   :  { %v1349_v44 = vmul.f32 -1.442695, %v2124_v13  ;;  %v1350_v28 = vmul.f32 -1.442695, %v2126_v1  ;;  %v1095_v50 = vmul.f32 %v2098_v63, %v1805_v58  ;;  %v861_v58 = vmul.f32 %v2085_v11, %v1791_v49 }
 0x3f4   :  { %1465 = vpow2.f32 %v1333_v5  ;;  %v1108_v20 = vpop.permute.xlu1 %1107 }
 0x3f5   :  { %1467 = vpow2.f32 %v1334_v23  ;;  %v2136_v14 = vadd.f32 %v1108_v20, %v1088_v2  ;;  %v2138_v0 = vadd.f32 %v1108_v20, %v1089_v6  ;;  %v893_v15 = vpop.permute.xlu0 %892 }
 0x3f6   :  { %1469 = vpow2.f32 %v1349_v44  ;;  %v2140_v34 = vadd.f32 %v893_v15, %v862_v37  ;;  %v2142_v36 = vadd.f32 %v893_v15, %v863_v59 }
 0x3f7   :  { %1471 = vpow2.f32 %v1350_v28  ;;  %v1341_v51 = vmul.f32 -1.442695, %v2136_v14  ;;  %v1342_v54 = vmul.f32 -1.442695, %v2138_v0 }
 0x3f8   :  { %v1331_v9 = vmul.f32 -1.442695, %v2140_v34  ;;  %v1332_v18 = vmul.f32 -1.442695, %v2142_v36 }
 0x3f9   :  { %1473 = vpow2.f32 %v1341_v51  ;;  %v873_v48 = vpop.permute.xlu1 %872 }
 0x3fa   :  { %1475 = vpow2.f32 %v1342_v54  ;;  %v2154_v22 = vadd.f32 %v873_v48, %v854_v57  ;;  %v2156_v53 = vadd.f32 %v873_v48, %v855_v52  ;;  %v1104_v33 = vpop.permute.xlu0 %1103  ;;  %v1094_v48 = vmul.f32 %v2098_v63, %v1801_v55 }
 0x3fb   :  { %1477 = vpow2.f32 %v1331_v9  ;;  %v2158_v29 = vadd.f32 %v1104_v33, %v1086_v42  ;;  %v2160_v31 = vadd.f32 %v1104_v33, %v1087_v21  ;;  %v860_v55 = vmul.f32 %v2085_v11, %v1785_v46 }
 0x3fc   :  { %1479 = vpow2.f32 %v1332_v18  ;;  %v1323_v25 = vmul.f32 -1.442695, %v2154_v22  ;;  %v1324_v30 = vmul.f32 -1.442695, %v2156_v53 }
 0x3fd   :  { %v1462_v35 = vpop.eup %1461  ;;  %v1339_v5 = vmul.f32 -1.442695, %v2158_v29  ;;  %v1340_v44 = vmul.f32 -1.442695, %v2160_v31 }
 0x3fe   :  { %v1464_v32 = vpop.eup %1463  ;;  %v976_v8 = vadd.f32 1.0, %v1462_v35  ;;  %1481 = vpow2.f32 %v1323_v25  ;;  %v1116_v23 = vpop.permute.xlu0 %1115 }
 0x3ff   :  { %v1120_v2 = vpop.permute.xlu1 %1119  ;;  %v977_v6 = vadd.f32 1.0, %v1464_v32  ;;  %1483 = vpow2.f32 %v1324_v30  ;;  %v2168_v28 = vadd.f32 %v1116_v23, %v1092_v7  ;;  %v2173_v42 = vadd.f32 %v1116_v23, %v1093_v47 }
 0x400   :  { %1485 = vrcp.f32 %v976_v8  ;;  %v2179_v32 = vadd.f32 %v1120_v2, %v1094_v48  ;;  %v2182_v23 = vadd.f32 %v1120_v2, %v1095_v50  ;;  %v859_v48 = vmul.f32 %v2100_v62, %v1773_v40 }
 0x401   :  { %v1466_v37 = vpop.eup %1465  ;;  %1487 = vrcp.f32 %v977_v6  ;;  %v1345_v9 = vmul.f32 -1.442695, %v2168_v28 }
 0x402   :  { %v1468_v59 = vpop.eup %1467  ;;  %v984_v20 = vadd.f32 1.0, %v1466_v37  ;;  %1489 = vpow2.f32 %v1339_v5  ;;  %v1346_v5 = vmul.f32 -1.442695, %v2173_v42  ;;  %v869_v37 = vmul.f32 %v2094_v4, %v1861_v26 }
 0x403   :  { %v1470_v15 = vpop.eup %1469  ;;  %v985_v51 = vadd.f32 1.0, %v1468_v59  ;;  %1491 = vpow2.f32 %v1340_v44  ;;  %v888_v54 = vpop.permute.xlu1 %887  ;;  %v868_v44 = vmul.f32 %v2094_v4, %v1847_v19  ;;  %v866_v59 = vmul.f32 %v2104_v3, %v1833_v10 }
 0x404   :  { %v1472_v57 = vpop.eup %1471  ;;  %1493 = vrcp.f32 %v984_v20  ;;  %v1208_v52 = vadd.f32 1.0, %v1470_v15  ;;  %v1347_v46 = vmul.f32 -1.442695, %v2179_v32  ;;  %v2195_v15 = vadd.f32 %v888_v54, %v860_v55 }
 0x405   :  { %1495 = vrcp.f32 %v985_v51  ;;  %v1209_v18 = vadd.f32 1.0, %v1472_v57  ;;  %v1348_v47 = vmul.f32 -1.442695, %v2182_v23  ;;  %v2198_v19 = vadd.f32 %v888_v54, %v861_v58 }
 0x406   :  { %v1474_v21 = vpop.eup %1473  ;;  %1497 = vrcp.f32 %v1208_v52  ;;  %v867_v10 = vmul.f32 %v2104_v3, %v1843_v16  ;;  %v1329_v3 = vmul.f32 -1.442695, %v2195_v15  ;;  %v1090_v58 = vmul.f32 %v2102_v56, %v1771_v39 }
 0x407   :  { %v1476_v33 = vpop.eup %1475  ;;  %1499 = vrcp.f32 %v1209_v18  ;;  %v1200_v60 = vadd.f32 1.0, %v1474_v21  ;;  %v908_v25 = vpop.permute.xlu1 %907 }
 0x408   :  { %v1478_v30 = vpop.eup %1477  ;;  %v1201_v35 = vadd.f32 1.0, %v1476_v33  ;;  %1501 = vpow2.f32 %v1345_v9  ;;  %v2203_v57 = vadd.f32 %v908_v25, %v868_v44  ;;  %v858_v9 = vmul.f32 %v2100_v62, %v1769_v38 }
 0x409   :  { %v1480_v7 = vpop.eup %1479  ;;  %1503 = vrcp.f32 %v1200_v60  ;;  %v982_v8 = vadd.f32 1.0, %v1478_v30  ;;  %v2208_v21 = vadd.f32 %v908_v25, %v869_v37  ;;  %v1330_v38 = vmul.f32 -1.442695, %v2198_v19 }
 0x40a   :  { %1505 = vrcp.f32 %v1201_v35  ;;  %v983_v63 = vadd.f32 1.0, %v1480_v7  ;;  %v1337_v40 = vmul.f32 -1.442695, %v2203_v57 }
 0x40b   :  { %v1482_v6 = vpop.eup %1481  ;;  %1507 = vrcp.f32 %v982_v8  ;;  %v883_v51 = vpop.permute.xlu1 %882  ;;  %v1338_v7 = vmul.f32 -1.442695, %v2208_v21 }
 0x40c   :  { %v1484_v2 = vpop.eup %1483  ;;  %1509 = vrcp.f32 %v983_v63  ;;  %v974_v20 = vadd.f32 1.0, %v1482_v6  ;;  %v2218_v62 = vadd.f32 %v883_v51, %v859_v48 }
 0x40d   :  { %v1486_v49 = vpop.eup %1485  ;;  %v975_v11 = vadd.f32 1.0, %v1484_v2  ;;  %1511 = vpow2.f32 %v1346_v5 }
 0x40e   :  { %v1488_v26 = vpop.eup %1487  ;;  %v1024_v4 = vmul.f32 %v1486_v49, %v2110_v43  ;;  %1513 = vrcp.f32 %v974_v20  ;;  %v903_v43 = vpop.permute.xlu0 %902  ;;  %v1328_v39 = vmul.f32 -1.442695, %v2218_v62 }
 0x40f   :  { %v1490_v52 = vpop.eup %1489  ;;  %v1025_v18 = vmul.f32 %v1488_v26, %v2112_v45  ;;  %1515 = vrcp.f32 %v975_v11  ;;  %v2214_v45 = vadd.f32 %v883_v51, %v858_v9  ;;  %v2222_v8 = vadd.f32 %v903_v43, %v866_v59 }
 0x410   :  { %v1492_v54 = vpop.eup %1491  ;;  %1040 = vst [vmem:[#allocation2 + $0x10] sm:$0xff] %v1024_v4  ;;  %v1198_v16 = vadd.f32 1.0, %v1490_v52  ;;  %1517 = vpow2.f32 %v1347_v46  ;;  %v1112_v5 = vpop.permute.xlu1 %1111  ;;  %v2227_v63 = vadd.f32 %v903_v43, %v867_v10  ;;  %v1100_v11 = vmul.f32 %v2096_v17, %v1863_v27  ;;  %v2303_v10 = vld [vmem:[#allocation7_spill] sm:$0xff] }
 0x411   :  { %v1494_v33 = vpop.eup %1493  ;;  %1041 = vst [vmem:[#allocation2 + $0x18] sm:$0xff] %v1025_v18  ;;  %v1199_v50 = vadd.f32 1.0, %v1492_v54  ;;  %1519 = vpow2.f32 %v1348_v47  ;;  %v1327_v37 = vmul.f32 -1.442695, %v2214_v45  ;;  %v1101_v4 = vmul.f32 %v2096_v17, %v2303_v10 }
 0x412   :  { %v1496_v60 = vpop.eup %1495  ;;  %v1032_v25 = vmul.f32 %v1494_v33, %v2120_v24  ;;  %1521 = vrcp.f32 %v1198_v16  ;;  %v1336_v51 = vmul.f32 -1.442695, %v2227_v63 }
 0x413   :  { %v1498_v30 = vpop.eup %1497  ;;  %v1033_v35 = vmul.f32 %v1496_v60, %v2122_v12  ;;  %1523 = vrcp.f32 %v1199_v50  ;;  %v1091_v12 = vmul.f32 %v2102_v56, %v1775_v41  ;;  %v1335_v41 = vmul.f32 -1.442695, %v2222_v8  ;;  %v2304_v50 = vld [vmem:[#allocation5_spill] sm:$0xff] }
 0x414   :  { %v1500_v55 = vpop.eup %1499  ;;  %1048 = vst [vmem:[#allocation2 + $0x50] sm:$0xff] %v1032_v25  ;;  %v1256_v24 = vmul.f32 %v1498_v30, %v2124_v13  ;;  %1525 = vpow2.f32 %v1329_v3  ;;  %v2234_v13 = vadd.f32 %v1112_v5, %v1090_v58  ;;  %v1128_v43 = vpop.permute.xlu1 %1127 }
 0x415   :  { %v1502_v6 = vpop.eup %1501  ;;  %1049 = vst [vmem:[#allocation2 + $0x58] sm:$0xff] %v1033_v35  ;;  %v1257_v44 = vmul.f32 %v1500_v55, %v2126_v1  ;;  %1527 = vpow2.f32 %v1330_v38  ;;  %v2238_v56 = vadd.f32 %v1112_v5, %v1091_v12  ;;  %v1132_v1 = vpop.permute.xlu0 %1131  ;;  %v1098_v38 = vmul.f32 %v2108_v61, %v2304_v50  ;;  %v2305_v12 = vld [vmem:[#allocation6_spill] sm:$0xff] }
 0x416   :  { %v1504_v59 = vpop.eup %1503  ;;  %1273 = vst [vmem:[#allocation2 + $0xd0] sm:$0xff] %v1256_v24  ;;  %v1204_v2 = vadd.f32 1.0, %v1502_v6  ;;  %1529 = vpow2.f32 %v1337_v40  ;;  %v1343_v27 = vmul.f32 -1.442695, %v2234_v13  ;;  %v2249_v18 = vadd.f32 %v1132_v1, %v1100_v11 }
 0x417   :  { %v1506_v20 = vpop.eup %1505  ;;  %1274 = vst [vmem:[#allocation2 + $0xd8] sm:$0xff] %v1257_v44  ;;  %v1248_v46 = vmul.f32 %v1504_v59, %v2136_v14  ;;  %1531 = vpow2.f32 %v1338_v7  ;;  %v1344_v48 = vmul.f32 -1.442695, %v2238_v56  ;;  %v2252_v17 = vadd.f32 %v1132_v1, %v1101_v4 }
 0x418   :  { %v1508_v49 = vpop.eup %1507  ;;  %v1249_v47 = vmul.f32 %v1506_v20, %v2138_v0  ;;  %1533 = vrcp.f32 %v1204_v2  ;;  %v1353_v25 = vmul.f32 -1.442695, %v2249_v18  ;;  %v2261_v7 = vadd.f32 %v1128_v43, %v1098_v38 }
 0x419   :  { %v1510_v26 = vpop.eup %1509  ;;  %1265 = vst [vmem:[#allocation2 + $0x90] sm:$0xff] %v1248_v46  ;;  %v1030_v14 = vmul.f32 %v1508_v49, %v2140_v34  ;;  %1535 = vpow2.f32 %v1327_v37  ;;  %v1099_v44 = vmul.f32 %v2108_v61, %v2305_v12 }
 0x41a   :  { %v1512_v52 = vpop.eup %1511  ;;  %1266 = vst [vmem:[#allocation2 + $0x98] sm:$0xff] %v1249_v47  ;;  %v1031_v9 = vmul.f32 %v1510_v26, %v2142_v36  ;;  %1537 = vpow2.f32 %v1328_v39  ;;  %v1351_v2 = vmul.f32 -1.442695, %v2261_v7 }
 0x41b   :  { %v1514_v0 = vpop.eup %1513  ;;  %1046 = vst [vmem:[#allocation2 + $0x40] sm:$0xff] %v1030_v14  ;;  %v1205_v54 = vadd.f32 1.0, %v1512_v52  ;;  %1539 = vpow2.f32 %v1335_v41  ;;  %v2267_v20 = vadd.f32 %v1128_v43, %v1099_v44 }
 0x41c   :  { %v1516_v16 = vpop.eup %1515  ;;  %1047 = vst [vmem:[#allocation2 + $0x48] sm:$0xff] %v1031_v9  ;;  %v1022_v34 = vmul.f32 %v1514_v0, %v2154_v22  ;;  %1541 = vpow2.f32 %v1336_v51  ;;  %v1354_v22 = vmul.f32 -1.442695, %v2252_v17 }
 0x41d   :  { %v1518_v3 = vpop.eup %1517  ;;  %v1023_v36 = vmul.f32 %v1516_v16, %v2156_v53  ;;  %1543 = vrcp.f32 %v1205_v54  ;;  %v1352_v26 = vmul.f32 -1.442695, %v2267_v20 }
 0x41e   :  { %v1520_v33 = vpop.eup %1519  ;;  %1038 = vst [vmem:[#allocation2] sm:$0xff] %v1022_v34  ;;  %v1206_v60 = vadd.f32 1.0, %v1518_v3  ;;  %1545 = vpow2.f32 %v1343_v27 }
 0x41f   :  { %v1522_v40 = vpop.eup %1521  ;;  %1039 = vst [vmem:[#allocation2 + $0x8] sm:$0xff] %v1023_v36  ;;  %v1207_v30 = vadd.f32 1.0, %v1520_v33  ;;  %1547 = vpow2.f32 %v1344_v48 }
 0x420   :  { %v1524_v35 = vpop.eup %1523  ;;  %v1246_v53 = vmul.f32 %v1522_v40, %v2158_v29  ;;  %1549 = vrcp.f32 %v1206_v60 }
 0x421   :  { %v1526_v5 = vpop.eup %1525  ;;  %v1247_v55 = vmul.f32 %v1524_v35, %v2160_v31  ;;  %1551 = vrcp.f32 %v1207_v30 }
 0x422   :  { %v1528_v58 = vpop.eup %1527  ;;  %1263 = vst [vmem:[#allocation2 + $0x80] sm:$0xff] %v1246_v53  ;;  %v980_v24 = vadd.f32 1.0, %v1526_v5  ;;  %1553 = vpow2.f32 %v1353_v25 }
 0x423   :  { %v1530_v6 = vpop.eup %1529  ;;  %1264 = vst [vmem:[#allocation2 + $0x88] sm:$0xff] %v1247_v55  ;;  %v981_v37 = vadd.f32 1.0, %v1528_v58  ;;  %1555 = vpow2.f32 %v1354_v22 }
 0x424   :  { %v1532_v59 = vpop.eup %1531  ;;  %1557 = vrcp.f32 %v980_v24  ;;  %v988_v29 = vadd.f32 1.0, %v1530_v6 }
 0x425   :  { %v1534_v39 = vpop.eup %1533  ;;  %1559 = vrcp.f32 %v981_v37  ;;  %v989_v31 = vadd.f32 1.0, %v1532_v59 }
 0x426   :  { %v1536_v46 = vpop.eup %1535  ;;  %v1252_v41 = vmul.f32 %v1534_v39, %v2168_v28  ;;  %1561 = vrcp.f32 %v988_v29 }
 0x427   :  { %v1538_v1 = vpop.eup %1537  ;;  %1563 = vrcp.f32 %v989_v31  ;;  %v978_v61 = vadd.f32 1.0, %v1536_v46 }
 0x428   :  { %v1540_v49 = vpop.eup %1539  ;;  %1269 = vst [vmem:[#allocation2 + $0xb0] sm:$0xff] %v1252_v41  ;;  %v979_v11 = vadd.f32 1.0, %v1538_v1  ;;  %1565 = vpow2.f32 %v1351_v2 }
 0x429   :  { %v1542_v47 = vpop.eup %1541  ;;  %1567 = vrcp.f32 %v978_v61  ;;  %v986_v51 = vadd.f32 1.0, %v1540_v49 }
 0x42a   :  { %v1544_v10 = vpop.eup %1543  ;;  %1569 = vrcp.f32 %v979_v11  ;;  %v987_v4 = vadd.f32 1.0, %v1542_v47 }
 0x42b   :  { %v1546_v14 = vpop.eup %1545  ;;  %v1253_v52 = vmul.f32 %v1544_v10, %v2173_v42  ;;  %1571 = vrcp.f32 %v986_v51 }
 0x42c   :  { %v1548_v28 = vpop.eup %1547  ;;  %1573 = vrcp.f32 %v987_v4  ;;  %v1202_v9 = vadd.f32 1.0, %v1546_v14 }
 0x42d   :  { %v1550_v27 = vpop.eup %1549  ;;  %1270 = vst [vmem:[#allocation2 + $0xb8] sm:$0xff] %v1253_v52  ;;  %v1203_v0 = vadd.f32 1.0, %v1548_v28  ;;  %1575 = vpow2.f32 %v1352_v26 }
 0x42e   :  { %v1552_v54 = vpop.eup %1551  ;;  %v1254_v48 = vmul.f32 %v1550_v27, %v2179_v32  ;;  %1577 = vrcp.f32 %v1202_v9 }
 0x42f   :  { %v1554_v16 = vpop.eup %1553  ;;  %v1255_v34 = vmul.f32 %v1552_v54, %v2182_v23  ;;  %1579 = vrcp.f32 %v1203_v0 }
 0x430   :  { %v1556_v3 = vpop.eup %1555  ;;  %1271 = vst [vmem:[#allocation2 + $0xc0] sm:$0xff] %v1254_v48  ;;  %v1212_v36 = vadd.f32 1.0, %v1554_v16 }
 0x431   :  { %v1558_v42 = vpop.eup %1557  ;;  %1272 = vst [vmem:[#allocation2 + $0xc8] sm:$0xff] %v1255_v34  ;;  %v1213_v43 = vadd.f32 1.0, %v1556_v3 }
 0x432   :  { %v1560_v33 = vpop.eup %1559  ;;  %v1028_v50 = vmul.f32 %v1558_v42, %v2195_v15  ;;  %1581 = vrcp.f32 %v1212_v36 }
 0x433   :  { %v1562_v38 = vpop.eup %1561  ;;  %v1029_v60 = vmul.f32 %v1560_v33, %v2198_v19  ;;  %1583 = vrcp.f32 %v1213_v43 }
 0x434   :  { %v1564_v32 = vpop.eup %1563  ;;  %1044 = vst [vmem:[#allocation2 + $0x30] sm:$0xff] %v1028_v50  ;;  %v1036_v25 = vmul.f32 %v1562_v38, %v2203_v57 }
 0x435   :  { %v1566_v23 = vpop.eup %1565  ;;  %1045 = vst [vmem:[#allocation2 + $0x38] sm:$0xff] %v1029_v60  ;;  %v1037_v40 = vmul.f32 %v1564_v32, %v2208_v21 }
 0x436   :  { %v1568_v30 = vpop.eup %1567  ;;  %1052 = vst [vmem:[#allocation2 + $0x70] sm:$0xff] %v1036_v25  ;;  %v1210_v22 = vadd.f32 1.0, %v1566_v23 }
 0x437   :  { %v1570_v35 = vpop.eup %1569  ;;  %1053 = vst [vmem:[#allocation2 + $0x78] sm:$0xff] %v1037_v40  ;;  %v1026_v15 = vmul.f32 %v1568_v30, %v2214_v45 }
 0x438   :  { %v1572_v53 = vpop.eup %1571  ;;  %v1027_v5 = vmul.f32 %v1570_v35, %v2218_v62  ;;  %1585 = vrcp.f32 %v1210_v22 }
 0x439   :  { %v1574_v19 = vpop.eup %1573  ;;  %1042 = vst [vmem:[#allocation2 + $0x20] sm:$0xff] %v1026_v15  ;;  %v1034_v55 = vmul.f32 %v1572_v53, %v2222_v8 }
 0x43a   :  { %v1576_v57 = vpop.eup %1575  ;;  %1043 = vst [vmem:[#allocation2 + $0x28] sm:$0xff] %v1027_v5  ;;  %v1035_v58 = vmul.f32 %v1574_v19, %v2227_v63 }
 0x43b   :  { %v1578_v21 = vpop.eup %1577  ;;  %1050 = vst [vmem:[#allocation2 + $0x60] sm:$0xff] %v1034_v55  ;;  %v1211_v24 = vadd.f32 1.0, %v1576_v57 }
 0x43c   :  { %v1580_v6 = vpop.eup %1579  ;;  %1051 = vst [vmem:[#allocation2 + $0x68] sm:$0xff] %v1035_v58  ;;  %v1250_v12 = vmul.f32 %v1578_v21, %v2234_v13 }
 0x43d   :  { %v1251_v45 = vmul.f32 %v1580_v6, %v2238_v56  ;;  %1587 = vrcp.f32 %v1211_v24 }
 0x43e   :  { %1267 = vst [vmem:[#allocation2 + $0xa0] sm:$0xff] %v1250_v12 }
 0x43f   :  { %v1582_v62 = vpop.eup %1581  ;;  %1268 = vst [vmem:[#allocation2 + $0xa8] sm:$0xff] %v1251_v45 }
 0x440   :  { %v1584_v44 = vpop.eup %1583  ;;  %v1260_v8 = vmul.f32 %v1582_v62, %v2249_v18 }
 0x441   :  { %v1261_v37 = vmul.f32 %v1584_v44, %v2252_v17 }
 0x442   :  { %1277 = vst [vmem:[#allocation2 + $0xf0] sm:$0xff] %v1260_v8 }
 0x443   :  { %1278 = vst [vmem:[#allocation2 + $0xf8] sm:$0xff] %v1261_v37 }
 0x445   :  { %v1586_v63 = vpop.eup %1585 }
 0x446   :  { %v1258_v59 = vmul.f32 %v1586_v63, %v2261_v7 }
 0x448   :  { %1275 = vst [vmem:[#allocation2 + $0xe0] sm:$0xff] %v1258_v59 }
 0x44a   :  { %v1588_v13 = vpop.eup %1587 }
 0x44b   :  { %v1259_v56 = vmul.f32 %v1588_v13, %v2267_v20 }
 0x44d   :  { %1276 = vst [vmem:[#allocation2 + $0xe8] sm:$0xff] %v1259_v56 }
 0x44e   :  { %1600 = shalt.err (!%p1597_p4)
}
 0x44f   :  { %s1619_s18 = smov 256   ;;  %s1620_s19 = smov 16  }
 0x450   :  { %1290 = dma.vmem_to_hbm [thread:$0]  %s1285_s16, 4096, %s2296_s5, [#allocation3], %s1619_s18, %s1619_s18, %s1620_s19  }
 0x451   :  { %1609 = dma.done.wait [#allocation3], 4096  }
 0x452   :  { %1610 = vsyncadd [#allocation3], 4294963200 }
 0x453   :  { %1294 = vsyncpa [#allocation3], 1 }

</bundles_post_ra>
